<compile_context>
chip_gen: v6e
topology: v6e:2x2x1
jax: 0.10.0
libtpu: 0.0.40
codegen_flags: <defaults>
</compile_context>

<pallas_src>
import functools
from math import sqrt

import jax
import jax.numpy as jnp
from jax.experimental import pallas as pl
from jax.experimental.pallas import tpu as pltpu


def _round_up(x, m):
    return (x + m - 1) // m * m


def _mix32(x):
    # murmur3-style finalizer on uint32 (pure VPU integer ops).
    x = x ^ (x >> 16)
    x = x * jnp.uint32(0x7FEB352D)
    x = x ^ (x >> 15)
    x = x * jnp.uint32(0x846CA68B)
    x = x ^ (x >> 16)
    return x


def _linear_layer_kernel(seed_ref, x_ref, w_ref, m_ref, mt_ref, g_ref, b_ref,
                         o_ref, *, p, eps, num_groups, group_size):
    # ---- Linear (no bias): bf16 operands on the MXU, f32 accumulation ----
    y = jnp.dot(x_ref[...], w_ref[...], preferred_element_type=jnp.float32)
    tn, cpad = y.shape

    # ---- GroupNorm(32, Cout), biased variance, two-pass (no cancellation) ----
    if group_size % 128 == 0:
        # Lane-aligned groups: XLU reduction + VPU broadcast, MXU stays free.
        yg = y.reshape(tn, num_groups, group_size)
        mean = jnp.mean(yg, axis=-1, keepdims=True)
        d = yg - mean
        var = jnp.mean(d * d, axis=-1, keepdims=True)
        yn = (d * jax.lax.rsqrt(var + eps)).reshape(tn, cpad)
    else:
        # Small / unaligned groups: one-hot matmuls for channel<->group maps.
        inv_gs = jnp.float32(1.0 / group_size)
        m = m_ref[...]        # (Cout_pad, G) one-hot, zero rows for padding
        mt = mt_ref[...]      # (G, Cout_pad) one-hot, zero cols for padding
        mean_c = jnp.dot(
            jnp.dot(y, m, preferred_element_type=jnp.float32) * inv_gs,
            mt, preferred_element_type=jnp.float32)
        d = y - mean_c
        var_c = jnp.dot(
            jnp.dot(d * d, m, preferred_element_type=jnp.float32) * inv_gs,
            mt, preferred_element_type=jnp.float32)
        yn = d * jax.lax.rsqrt(var_c + eps)

    # ---- Affine (1/(1-p) dropout scale pre-folded into gamma/beta) + ReLU ----
    yn = jnp.maximum(yn * g_ref[...] + b_ref[...], 0.0)

    # ---- Dropout (training semantics): u32 threshold compare, no f32 convert ----
    if p > 0.0:
        # Counter-based hash keyed on (seed, program_id, element index) so each
        # batch tile draws an independent mask even with the "parallel" grid.
        # TODO(synk): switch to pltpu.prng_seed/prng_random_bits (hardware PRNG)
        # when not targeting the interpret backend.
        row = jax.lax.broadcasted_iota(jnp.uint32, yn.shape, 0)
        col = jax.lax.broadcasted_iota(jnp.uint32, yn.shape, 1)
        seed32 = (seed_ref[0].astype(jnp.uint32)
                  + pl.program_id(0).astype(jnp.uint32) * jnp.uint32(0x9E3779B9))
        elem = row * jnp.uint32(cpad) + col
        bits = _mix32(elem + seed32 * jnp.uint32(0x85EBCA6B))
        thresh = jnp.uint32(min(int(round(p * 4294967296.0)), 0xFFFFFFFF))
        yn = jnp.where(bits >= thresh, yn, 0.0)

    o_ref[...] = yn


def prepare_params(w, gamma, beta, *, num_groups=32, dropout_p=0.0):
    """One-time parameter prep (outside the per-step hot path).

    w: (Cout, Cin) PyTorch Linear layout; gamma/beta: (Cout,).
    Pads Cout to a multiple of 128 (lane-dense stores), pre-transposes and
    casts the weight to bf16, builds the one-hot group maps, and folds the
    dropout 1/(1-p) scale into gamma/beta."""
    cout, cin = w.shape
    assert cout % num_groups == 0, "GroupNorm requires out_features % 32 == 0"
    group_size = cout // num_groups
    cout_pad = _round_up(cout, 128)

    w_t = jnp.zeros((cin, cout_pad), jnp.float32)
    w_t = w_t.at[:, :cout].set(jnp.transpose(w).astype(jnp.float32))
    w_t = w_t.astype(jnp.bfloat16)                       # resident bf16 weight

    ch_ids = jnp.arange(cout) // group_size
    m = jnp.zeros((cout_pad, num_groups), jnp.float32)
    m = m.at[:cout].set(jax.nn.one_hot(ch_ids, num_groups, dtype=jnp.float32))
    mt = jnp.transpose(m)

    scale = 1.0 / (1.0 - dropout_p) if dropout_p > 0.0 else 1.0
    g = jnp.zeros((1, cout_pad), jnp.float32).at[0, :cout].set(
        gamma.astype(jnp.float32) * scale)
    b = jnp.zeros((1, cout_pad), jnp.float32).at[0, :cout].set(
        beta.astype(jnp.float32) * scale)

    return dict(w_t=w_t, m=m, mt=mt, gamma=g, beta=b,
                cin=cin, cout=cout, cout_pad=cout_pad,
                num_groups=num_groups, group_size=group_size,
                dropout_p=float(dropout_p))


def linear_layer_forward(x, params, *, eps=1e-5, seed=0, tile_n=256):
    """x: (N, Cin) f32.  Returns (N, Cout) f32."""
    n, cin = x.shape
    assert cin == params["cin"]
    cout, cout_pad = params["cout"], params["cout_pad"]
    num_groups = params["num_groups"]
    p = params["dropout_p"]

    # Batch tile: multiple of 16 (bf16 sublane packing), capped for VMEM.
    tn = _round_up(min(tile_n, _round_up(n, 16)), 16)
    n_pad = _round_up(n, tn)
    grid = (n_pad // tn,)

    x_p = jnp.zeros((n_pad, cin), jnp.bfloat16).at[:n].set(x.astype(jnp.bfloat16))
    seed_arr = jnp.asarray([seed], dtype=jnp.int32)

    kernel = functools.partial(_linear_layer_kernel, p=p, eps=float(eps),
                               num_groups=num_groups,
                               group_size=params["group_size"])

    resident = lambda i, s: (0, 0)          # stays in VMEM across grid steps

    # VMEM budget: resident params + double-buffered x / out tiles (+ headroom).
    resident_bytes = (params["w_t"].size * 2
                      + (params["m"].size + params["mt"].size) * 4
                      + (params["gamma"].size + params["beta"].size) * 4)
    tile_bytes = 2 * (tn * cin * 2) + 2 * (tn * cout_pad * 4)
    vmem_limit = int(min(max(4 * (resident_bytes + tile_bytes), 32 << 20), 48 << 20))

    out = pl.pallas_call(
        kernel,
        out_shape=jax.ShapeDtypeStruct((n_pad, cout_pad), jnp.float32),
        grid_spec=pltpu.PrefetchScalarGridSpec(
            num_scalar_prefetch=1,                       # seed -> SMEM
            grid=grid,
            in_specs=[
                pl.BlockSpec((tn, cin), lambda i, s: (i, 0)),        # x tile
                pl.BlockSpec((cin, cout_pad), resident),             # W^T bf16
                pl.BlockSpec((cout_pad, num_groups), resident),      # one-hot
                pl.BlockSpec((num_groups, cout_pad), resident),      # one-hot^T
                pl.BlockSpec((1, cout_pad), resident),               # gamma
                pl.BlockSpec((1, cout_pad), resident),               # beta
            ],
            out_specs=pl.BlockSpec((tn, cout_pad), lambda i, s: (i, 0)),
        ),
        compiler_params=pltpu.CompilerParams(
            dimension_semantics=("parallel",),
            vmem_limit_bytes=vmem_limit,
        ),
    )(seed_arr, x_p, params["w_t"], params["m"], params["mt"],
      params["gamma"], params["beta"])

    return out[:n, :cout]


def _reference_forward(x, w, gamma, beta, *, num_groups=32, eps=1e-5):
    """Pure-JAX reference (dropout disabled). Mirrors the kernel's bf16 MXU
    operands with f32 accumulation so the comparison is apples-to-apples."""
    y = jnp.dot(x.astype(jnp.bfloat16), jnp.transpose(w).astype(jnp.bfloat16),
                preferred_element_type=jnp.float32)
    n, c = y.shape
    yg = y.reshape(n, num_groups, c // num_groups)
    mean = yg.mean(-1, keepdims=True)
    var = ((yg - mean) ** 2).mean(-1, keepdims=True)
    yn = ((yg - mean) * jax.lax.rsqrt(var + eps)).reshape(n, c)
    yn = yn * gamma.reshape(1, c) + beta.reshape(1, c)
    return jnp.maximum(yn, 0.0)


if __name__ == "__main__":
    # Small shapes consistent with the module: GroupNorm(32, out_features)
    # requires out_features % 32 == 0.
    batch = 16
    in_features = 64
    out_features = 128          # group size 4
    dropout_p = 0.25

    key = jax.random.PRNGKey(0)
    kx, kw, kg, kb = jax.random.split(key, 4)
    x = jax.random.normal(kx, (batch, in_features), dtype=jnp.float32)
    w = jax.random.normal(kw, (out_features, in_features),
                          dtype=jnp.float32) * (1.0 / sqrt(in_features))
    gamma = 1.0 + 0.1 * jax.random.normal(kg, (out_features,), dtype=jnp.float32)
    beta = 0.1 * jax.random.normal(kb, (out_features,), dtype=jnp.float32)

    # Correctness check against the pure-JAX reference (dropout disabled).
    params_eval = prepare_params(w, gamma, beta, num_groups=32, dropout_p=0.0)
    out_eval = linear_layer_forward(x, params_eval)
    ref = _reference_forward(x, w, gamma, beta, num_groups=32)
    assert out_eval.shape == ref.shape
    assert jnp.allclose(out_eval, ref, atol=1e-3, rtol=1e-3), "mismatch vs reference"

    # Training-mode forward with fused in-kernel dropout.
    params_train = prepare_params(w, gamma, beta, num_groups=32,
                                  dropout_p=dropout_p)
    out_train = linear_layer_forward(x, params_train, seed=0)
    jax.block_until_ready(out_train)
    assert out_train.shape == (batch, out_features)
    assert bool(jnp.all(jnp.isfinite(out_train)))
    print("KERNEL_OK")
</pallas_src>

<mosaic_0001>
module attributes {stable_mosaic.version = 11 : i64} {
  func.func @_linear_layer_kernel(%arg0: i32, %arg1: memref<1xi32, #tpu.memory_space<smem>>, %arg2: memref<16x64xbf16, #tpu.memory_space<vmem>>, %arg3: memref<64x128xbf16, #tpu.memory_space<vmem>>, %arg4: memref<128x32xf32, #tpu.memory_space<vmem>>, %arg5: memref<32x128xf32, #tpu.memory_space<vmem>>, %arg6: memref<1x128xf32, #tpu.memory_space<vmem>>, %arg7: memref<1x128xf32, #tpu.memory_space<vmem>>, %arg8: memref<16x128xf32, #tpu.memory_space<vmem>>) attributes {dimension_semantics = [#tpu.dimension_semantics<parallel>], iteration_bounds = array<i64: 1>, scalar_prefetch = 1 : i64, scratch_operands = 0 : i64, tpu.core_type = #tpu.core_type<tc>, window_params = [{transform_indices = @transform_0, window_bounds = array<i64: 16, 64>}, {pipeline_mode = #tpu.pipeline_mode<synchronous>, transform_indices = @transform_1, window_bounds = array<i64: 64, 128>}, {pipeline_mode = #tpu.pipeline_mode<synchronous>, transform_indices = @transform_2, window_bounds = array<i64: 128, 32>}, {pipeline_mode = #tpu.pipeline_mode<synchronous>, transform_indices = @transform_3, window_bounds = array<i64: 32, 128>}, {pipeline_mode = #tpu.pipeline_mode<synchronous>, transform_indices = @transform_4, window_bounds = array<i64: 1, 128>}, {pipeline_mode = #tpu.pipeline_mode<synchronous>, transform_indices = @transform_5, window_bounds = array<i64: 1, 128>}, {transform_indices = @transform_6, window_bounds = array<i64: 16, 128>}]} {
    %c0 = arith.constant 0 : index
    %c0_0 = arith.constant 0 : index
    %0 = vector.load %arg2[%c0, %c0_0] : memref<16x64xbf16, #tpu.memory_space<vmem>>, vector<16x64xbf16>
    %c0_1 = arith.constant 0 : index
    %c0_2 = arith.constant 0 : index
    %1 = vector.load %arg3[%c0_1, %c0_2] : memref<64x128xbf16, #tpu.memory_space<vmem>>, vector<64x128xbf16>
    %cst = arith.constant dense<0.000000e+00> : vector<16x128xf32>
    %2 = tpu.matmul %0, %1, %cst {dimension_numbers = #tpu.dot_dimension_numbers<[1], [0], [0], [1], [0, 0, 1, 1], [], []>} : vector<16x64xbf16>, vector<64x128xbf16>, vector<16x128xf32> -> vector<16x128xf32>
    %c0_3 = arith.constant 0 : index
    %c0_4 = arith.constant 0 : index
    %3 = vector.load %arg4[%c0_3, %c0_4] : memref<128x32xf32, #tpu.memory_space<vmem>>, vector<128x32xf32>
    %c0_5 = arith.constant 0 : index
    %c0_6 = arith.constant 0 : index
    %4 = vector.load %arg5[%c0_5, %c0_6] : memref<32x128xf32, #tpu.memory_space<vmem>>, vector<32x128xf32>
    %cst_7 = arith.constant dense<0.000000e+00> : vector<16x32xf32>
    %5 = tpu.matmul %2, %3, %cst_7 {dimension_numbers = #tpu.dot_dimension_numbers<[1], [0], [0], [1], [0, 0, 1, 1], [], []>} : vector<16x128xf32>, vector<128x32xf32>, vector<16x32xf32> -> vector<16x32xf32>
    %cst_8 = arith.constant 2.500000e-01 : f32
    %6 = vector.broadcast %cst_8 : f32 to vector<16x32xf32>
    %7 = arith.mulf %5, %6 : vector<16x32xf32>
    %cst_9 = arith.constant dense<0.000000e+00> : vector<16x128xf32>
    %8 = tpu.matmul %7, %4, %cst_9 {dimension_numbers = #tpu.dot_dimension_numbers<[1], [0], [0], [1], [0, 0, 1, 1], [], []>} : vector<16x32xf32>, vector<32x128xf32>, vector<16x128xf32> -> vector<16x128xf32>
    %9 = arith.subf %2, %8 : vector<16x128xf32>
    %10 = arith.mulf %9, %9 : vector<16x128xf32>
    %cst_10 = arith.constant dense<0.000000e+00> : vector<16x32xf32>
    %11 = tpu.matmul %10, %3, %cst_10 {dimension_numbers = #tpu.dot_dimension_numbers<[1], [0], [0], [1], [0, 0, 1, 1], [], []>} : vector<16x128xf32>, vector<128x32xf32>, vector<16x32xf32> -> vector<16x32xf32>
    %cst_11 = arith.constant 2.500000e-01 : f32
    %12 = vector.broadcast %cst_11 : f32 to vector<16x32xf32>
    %13 = arith.mulf %11, %12 : vector<16x32xf32>
    %cst_12 = arith.constant dense<0.000000e+00> : vector<16x128xf32>
    %14 = tpu.matmul %13, %4, %cst_12 {dimension_numbers = #tpu.dot_dimension_numbers<[1], [0], [0], [1], [0, 0, 1, 1], [], []>} : vector<16x32xf32>, vector<32x128xf32>, vector<16x128xf32> -> vector<16x128xf32>
    %cst_13 = arith.constant 9.99999974E-6 : f32
    %15 = vector.broadcast %cst_13 : f32 to vector<16x128xf32>
    %16 = arith.addf %14, %15 : vector<16x128xf32>
    %17 = math.rsqrt %16 : vector<16x128xf32>
    %18 = arith.mulf %9, %17 : vector<16x128xf32>
    %c0_14 = arith.constant 0 : index
    %c0_15 = arith.constant 0 : index
    %19 = vector.load %arg6[%c0_14, %c0_15] : memref<1x128xf32, #tpu.memory_space<vmem>>, vector<1x128xf32>
    %20 = vector.broadcast %19 : vector<1x128xf32> to vector<16x128xf32>
    %21 = arith.mulf %18, %20 : vector<16x128xf32>
    %c0_16 = arith.constant 0 : index
    %c0_17 = arith.constant 0 : index
    %22 = vector.load %arg7[%c0_16, %c0_17] : memref<1x128xf32, #tpu.memory_space<vmem>>, vector<1x128xf32>
    %23 = vector.broadcast %22 : vector<1x128xf32> to vector<16x128xf32>
    %24 = arith.addf %21, %23 : vector<16x128xf32>
    %cst_18 = arith.constant 0.000000e+00 : f32
    %25 = vector.broadcast %cst_18 : f32 to vector<16x128xf32>
    %26 = arith.maximumf %24, %25 : vector<16x128xf32>
    %c0_19 = arith.constant 0 : index
    %c0_20 = arith.constant 0 : index
    %27 = vector.load %arg8[%c0_19, %c0_20] : memref<16x128xf32, #tpu.memory_space<vmem>>, vector<16x128xf32>
    tpu.vector_store %arg8[%c0_19, %c0_20], %26 {strides = array<i32>} : memref<16x128xf32, #tpu.memory_space<vmem>>, vector<16x128xf32>,
    return
  }
  func.func @transform_0(%arg0: i32, %arg1: memref<1xi32, #tpu.memory_space<smem>>) -> (i32, i32) {
    %c0_i32 = arith.constant 0 : i32
    %c0_i32_0 = arith.constant 0 : i32
    return %arg0, %c0_i32 : i32, i32
  }
  func.func @transform_1(%arg0: i32, %arg1: memref<1xi32, #tpu.memory_space<smem>>) -> (i32, i32) {
    %c0_i32 = arith.constant 0 : i32
    %c0_i32_0 = arith.constant 0 : i32
    %c0_i32_1 = arith.constant 0 : i32
    return %c0_i32, %c0_i32_0 : i32, i32
  }
  func.func @transform_2(%arg0: i32, %arg1: memref<1xi32, #tpu.memory_space<smem>>) -> (i32, i32) {
    %c0_i32 = arith.constant 0 : i32
    %c0_i32_0 = arith.constant 0 : i32
    %c0_i32_1 = arith.constant 0 : i32
    return %c0_i32, %c0_i32_0 : i32, i32
  }
  func.func @transform_3(%arg0: i32, %arg1: memref<1xi32, #tpu.memory_space<smem>>) -> (i32, i32) {
    %c0_i32 = arith.constant 0 : i32
    %c0_i32_0 = arith.constant 0 : i32
    %c0_i32_1 = arith.constant 0 : i32
    return %c0_i32, %c0_i32_0 : i32, i32
  }
  func.func @transform_4(%arg0: i32, %arg1: memref<1xi32, #tpu.memory_space<smem>>) -> (i32, i32) {
    %c0_i32 = arith.constant 0 : i32
    %c0_i32_0 = arith.constant 0 : i32
    %c0_i32_1 = arith.constant 0 : i32
    return %c0_i32, %c0_i32_0 : i32, i32
  }
  func.func @transform_5(%arg0: i32, %arg1: memref<1xi32, #tpu.memory_space<smem>>) -> (i32, i32) {
    %c0_i32 = arith.constant 0 : i32
    %c0_i32_0 = arith.constant 0 : i32
    %c0_i32_1 = arith.constant 0 : i32
    return %c0_i32, %c0_i32_0 : i32, i32
  }
  func.func @transform_6(%arg0: i32, %arg1: memref<1xi32, #tpu.memory_space<smem>>) -> (i32, i32) {
    %c0_i32 = arith.constant 0 : i32
    %c0_i32_0 = arith.constant 0 : i32
    return %arg0, %c0_i32 : i32, i32
  }
}

</mosaic_0001>

<bundles_post_ra>
// kernel: tpu_custom_call.1
= control target key start
LH: loop header
LB: loop body
LE: loop exit
PB: predicated region body
PF: predicated region fallthrough
CT: control target
= control target key end

     0   :  { %v699_v1 = vmov 0.0   ;;  %vm700_vm0 = vmmov 0   ;;  %s832_s0 = inlined_call_operand.<no memory space> [shape: s32[1], index: 0, kind: input, shape index: {}]   ;;  %s833_s1 = inlined_call_operand.vmem [shape: bf16[16,64], index: 1, kind: input, shape index: {}]   ;;  %s834_s2 = inlined_call_operand.vmem [shape: bf16[64,128], index: 2, kind: input, shape index: {}]   ;;  %s835_s3 = inlined_call_operand.vmem [shape: f32[128,32], index: 3, kind: input, shape index: {}]   ;;  %s836_s4 = inlined_call_operand.vmem [shape: f32[32,128], index: 4, kind: input, shape index: {}]   ;;  %s837_s5 = inlined_call_operand.vmem [shape: f32[1,128], index: 5, kind: input, shape index: {}]   ;;  %s838_s6 = inlined_call_operand.vmem [shape: f32[1,128], index: 6, kind: input, shape index: {}]   ;;  %s839_s7 = inlined_call_operand.hbm [shape: f32[16,128], index: 7, kind: output, shape index: {}]  }
   0x1   :  { %v668_v0 = vld [vmem:[%s834_s2 + $0x18] sm:$0xff]   ;;  %559 = vmatprep.subr.bf16.mxu0 %v699_v1  ;;  %v669_v2 = vld [vmem:[%s834_s2 + $0x10] sm:$0xff]   ;;  %567 = vmatprep.mubr.msk.bf16.mxu0 %vm700_vm0, %v699_v1  ;;  %v670_v5 = vld [vmem:[%s834_s2 + $0x8] sm:$0xff]  }
   0x2   :  { %560 = vmatpush3.bf16.msra.mxu0 %v668_v0  ;;  %v126_v3 = vld [vmem:[%s835_s3 + $0x78] sm:$0xff]  ;;  %v125_v4 = vld [vmem:[%s835_s3 + $0x70] sm:$0xff]  ;;  %v124_v6 = vld [vmem:[%s835_s3 + $0x68] sm:$0xff] }
   0x3   :  { %561 = vmatprep.subr.bf16.mxu0 %v699_v1  ;;  %571 = vmatprep.subr.mxu1 %v126_v3  ;;  %v123_v7 = vld [vmem:[%s835_s3 + $0x60] sm:$0xff] }
   0x4   :  { %572 = vmatpush3.msra.mxu1 %v126_v3 }
   0x5   :  { %573 = vmatprep.subr.mxu1 %v125_v4 }
   0x6   :  { %562 = vmatpush3.bf16.msra.mxu0 %v669_v2  ;;  %574 = vmatpush3.msra.mxu1 %v125_v4 }
   0x7   :  { %563 = vmatprep.subr.bf16.mxu0 %v699_v1 }
   0x8   :  { %13 = vsyncpa [#allocation5], 0  ;;  %v671_v8 = vld [vmem:[%s834_s2] sm:$0xff]   ;;  %575 = vmatprep.subr.mxu1 %v124_v6  ;;  %v122_v9 = vld [vmem:[%s835_s3 + $0x58] sm:$0xff]  ;;  %vm66_vm1 = vcmask 523264   ;;  %vm208_vm2 = vcmask 261120  }
   0x9   :  { %576 = vmatpush3.msra.mxu1 %v124_v6  ;;  %v672_v10 = vld [vmem:[%s833_s1] sm:$0xff]   ;;  %v121_v11 = vld [vmem:[%s835_s3 + $0x50] sm:$0xff]  ;;  %v120_v12 = vld [vmem:[%s835_s3 + $0x48] sm:$0xff]  ;;  %s701_s1 = smov [#allocation4]  }
   0xa   :  { %564 = vmatpush3.bf16.msra.mxu0 %v670_v5  ;;  %577 = vmatprep.subr.mxu1 %v123_v7  ;;  %v119_v13 = vld [vmem:[%s835_s3 + $0x40] sm:$0xff]  ;;  %v118_v14 = vld [vmem:[%s835_s3 + $0x38] sm:$0xff]  ;;  %v117_v15 = vld [vmem:[%s835_s3 + $0x30] sm:$0xff]  ;;  %s483_s24 = sshll.u32 %s701_s1, 4  ;;  %s484_s24 = int_to_ptr.vmem [resolvable:$true] %s483_s24 }
   0xb   :  { %565 = vmatprep.subr.bf16.mxu0 %v699_v1  ;;  %578 = vmatpush3.msra.mxu1 %v123_v7  ;;  %v116_v16 = vld [vmem:[%s835_s3 + $0x28] sm:$0xff]  ;;  %v115_v17 = vld [vmem:[%s835_s3 + $0x20] sm:$0xff]  ;;  %v114_v18 = vld [vmem:[%s835_s3 + $0x18] sm:$0xff]  ;;  %s677_s25 = scalar_lea.vmem %s484_s24, 256  ;;  %p682_p1 = scmp.lt.s32.totalorder %s484_s24, %s484_s24 }
   0xc   :  { %579 = vmatprep.subr.mxu1 %v122_v9  ;;  %v113_v19 = vld [vmem:[%s835_s3 + $0x10] sm:$0xff]  ;;  %v112_v20 = vld [vmem:[%s835_s3 + $0x8] sm:$0xff]  ;;  %v111_v21 = vld [vmem:[%s835_s3] sm:$0xff]  ;;  %p678_p0 = scmp.ne.s32.totalorder %s484_s24, %s677_s25  ;;  %p683_p2 = scmp.lt.s32.totalorder %s677_s25, %s677_s25 }
   0xd   :  { %580 = vmatpush3.msra.mxu1 %v122_v9  ;;  %v130_v22 = vld [vmem:[%s836_s4 + $0x18] sm:$0xff]  ;;  %v129_v27 = vld [vmem:[%s836_s4 + $0x10] sm:$0xff]  ;;  %v128_v28 = vld [vmem:[%s836_s4 + $0x8] sm:$0xff] }
   0xe   :  { %566 = vmatpush3.bf16.msra.mxu0 %v671_v8  ;;  %581 = vmatprep.subr.mxu1 %v121_v11  ;;  %v127_v29 = vld [vmem:[%s836_s4] sm:$0xff]  ;;  %p684_p3 = por %p683_p2, %p682_p1 }
   0xf   :  { %617 = vmatprep.subr.mxu0 %v126_v3  ;;  %582 = vmatpush3.msra.mxu1 %v121_v11  ;;  %v504_v49 = vld [vmem:[%s837_s5] ss:$0 sm:$0xff] }
  0x10   :  { %583 = vmatprep.subr.mxu1 %v120_v12  ;;  %v505_v52 = vld [vmem:[%s838_s6] ss:$0 sm:$0xff]  ;;  %p685_p4 = pnand %p684_p3, %p678_p0 }
  0x11   :  { %568 = vmatmul.mubr.msk.bf16.vlgmr.msra.gmra.mxu0 %vm66_vm1, %v672_v10  ;;  %584 = vmatpush3.msra.mxu1 %v120_v12 }
  0x12   :  { %618 = vmatpush3.msra.mxu0 %v126_v3  ;;  %585 = vmatprep.subr.mxu1 %v119_v13 }
  0x13   :  { %619 = vmatprep.subr.mxu0 %v125_v4  ;;  %586 = vmatpush3.msra.mxu1 %v119_v13 }
  0x14   :  { %620 = vmatpush3.msra.mxu0 %v125_v4  ;;  %587 = vmatprep.subr.mxu1 %v118_v14 }
  0x15   :  { %621 = vmatprep.subr.mxu0 %v124_v6  ;;  %588 = vmatpush3.msra.mxu1 %v118_v14 }
  0x16   :  { %622 = vmatpush3.msra.mxu0 %v124_v6  ;;  %589 = vmatprep.subr.mxu1 %v117_v15 }
  0x17   :  { %623 = vmatprep.subr.mxu0 %v123_v7  ;;  %590 = vmatpush3.msra.mxu1 %v117_v15 }
  0x18   :  { %624 = vmatpush3.msra.mxu0 %v123_v7  ;;  %591 = vmatprep.subr.mxu1 %v116_v16 }
  0x19   :  { %625 = vmatprep.subr.mxu0 %v122_v9  ;;  %592 = vmatpush3.msra.mxu1 %v116_v16 }
  0x1a   :  { %626 = vmatpush3.msra.mxu0 %v122_v9  ;;  %593 = vmatprep.subr.mxu1 %v115_v17 }
  0x1b   :  { %627 = vmatprep.subr.mxu0 %v121_v11  ;;  %594 = vmatpush3.msra.mxu1 %v115_v17 }
  0x1c   :  { %628 = vmatpush3.msra.mxu0 %v121_v11  ;;  %595 = vmatprep.subr.mxu1 %v114_v18 }
  0x1d   :  { %629 = vmatprep.subr.mxu0 %v120_v12  ;;  %596 = vmatpush3.msra.mxu1 %v114_v18 }
  0x1e   :  { %630 = vmatpush3.msra.mxu0 %v120_v12  ;;  %597 = vmatprep.subr.mxu1 %v113_v19 }
  0x1f   :  { %631 = vmatprep.subr.mxu0 %v119_v13  ;;  %598 = vmatpush3.msra.mxu1 %v113_v19 }
  0x20   :  { %632 = vmatpush3.msra.mxu0 %v119_v13  ;;  %599 = vmatprep.subr.mxu1 %v112_v20 }
  0x21   :  { %633 = vmatprep.subr.mxu0 %v118_v14  ;;  %600 = vmatpush3.msra.mxu1 %v112_v20 }
  0x22   :  { %634 = vmatpush3.msra.mxu0 %v118_v14  ;;  %601 = vmatprep.subr.mxu1 %v111_v21 }
  0x23   :  { %635 = vmatprep.subr.mxu0 %v117_v15  ;;  %602 = vmatpush3.msra.mxu1 %v111_v21 }
  0x24   :  { %636 = vmatpush3.msra.mxu0 %v117_v15  ;;  %606 = vmatprep.subr.mxu1 %v130_v22 }
  0x25   :  { %637 = vmatprep.subr.mxu0 %v116_v16 }
  0x26   :  { %638 = vmatpush3.msra.mxu0 %v116_v16 }
  0x27   :  { %639 = vmatprep.subr.mxu0 %v115_v17 }
  0x28   :  { %640 = vmatpush3.msra.mxu0 %v115_v17 }
  0x29   :  { %641 = vmatprep.subr.mxu0 %v114_v18 }
  0x2a   :  { %642 = vmatpush3.msra.mxu0 %v114_v18 }
  0x2b   :  { %643 = vmatprep.subr.mxu0 %v113_v19 }
  0x2c   :  { %644 = vmatpush3.msra.mxu0 %v113_v19 }
  0x2d   :  { %645 = vmatprep.subr.mxu0 %v112_v20 }
  0x2e   :  { %646 = vmatpush3.msra.mxu0 %v112_v20 }
  0x2f   :  { %647 = vmatprep.subr.mxu0 %v111_v21 }
  0x30   :  { %648 = vmatpush3.msra.mxu0 %v111_v21 }
  0xd1   :  { %v104_v23 = vpop.f32.mrf.mxu0 }
  0xd2   :  { %603 = vmatprep.mubr.f32.mxu1 %v104_v23 }
  0xd3   :  { %v569_v24 = vpop.f32.mrf.mxu0 }
  0xd5   :  { %v107_v25 = vpop.f32.mrf.mxu0 }
  0xd6   :  { %604 = vmatmul.mubr.f32.vlgmr.msra.gmra.mxu1 %v107_v25 }
  0xd7   :  { %v570_v26 = vpop.f32.mrf.mxu0  ;;  %607 = vmatpush3.msra.mxu1 %v130_v22 }
  0xd8   :  { %608 = vmatprep.subr.mxu1 %v129_v27 }
  0xd9   :  { %609 = vmatpush3.msra.mxu1 %v129_v27 }
  0xda   :  { %610 = vmatprep.subr.mxu1 %v128_v28 }
  0xdb   :  { %611 = vmatpush3.msra.mxu1 %v128_v28 }
  0xdc   :  { %612 = vmatprep.subr.mxu1 %v127_v29 }
  0xdd   :  { %613 = vmatpush3.msra.mxu1 %v127_v29 }
  0xde   :  { %652 = vmatprep.subr.mxu1 %v130_v22 }
 0x196   :  { %v605_v30 = vpop.f32.mrf.mxu1 }
 0x197   :  { %v207_v33 = vmul.f32 0.25, %v605_v30 }
 0x198   :  { %v197_v31 = vpop.f32.mrf.mxu1 }
 0x199   :  { %v206_v32 = vmul.f32 0.25, %v197_v31 }
 0x19b   :  { %614 = vmatprep.mubr.msk.f32.mxu1 %vm208_vm2, %v206_v32 }
 0x19c   :  { %615 = vmatmul.mubr.msk.f32.vlgmr.msra.gmra.mxu1 %vm208_vm2, %v207_v33 }
 0x19d   :  { %653 = vmatpush3.msra.mxu1 %v130_v22 }
 0x19e   :  { %654 = vmatprep.subr.mxu1 %v129_v27 }
 0x19f   :  { %655 = vmatpush3.msra.mxu1 %v129_v27 }
 0x1a0   :  { %656 = vmatprep.subr.mxu1 %v128_v28 }
 0x1a1   :  { %657 = vmatpush3.msra.mxu1 %v128_v28 }
 0x1a2   :  { %658 = vmatprep.subr.mxu1 %v127_v29 }
 0x1a3   :  { %659 = vmatpush3.msra.mxu1 %v127_v29 }
 0x25c   :  { %v616_v34 = vpop.f32.mrf.mxu1 }
 0x25d   :  { %v291_v35 = vsub.f32 %v107_v25, %v616_v34 }
 0x25e   :  { %v281_v36 = vpop.f32.mrf.mxu1 }
 0x25f   :  { %v290_v37 = vsub.f32 %v104_v23, %v281_v36  ;;  %v293_v39 = vmul.f32 %v291_v35, %v291_v35 }
 0x261   :  { %v292_v38 = vmul.f32 %v290_v37, %v290_v37 }
 0x263   :  { %649 = vmatprep.mubr.f32.mxu0 %v292_v38 }
 0x264   :  { %650 = vmatmul.mubr.f32.vlgmr.msra.gmra.mxu0 %v293_v39 }
 0x324   :  { %v651_v40 = vpop.f32.mrf.mxu0 }
 0x325   :  { %v370_v43 = vmul.f32 0.25, %v651_v40 }
 0x326   :  { %v360_v41 = vpop.f32.mrf.mxu0 }
 0x327   :  { %v369_v42 = vmul.f32 0.25, %v360_v41 }
 0x329   :  { %660 = vmatprep.mubr.msk.f32.mxu1 %vm208_vm2, %v369_v42 }
 0x32a   :  { %661 = vmatmul.mubr.msk.f32.vlgmr.msra.gmra.mxu1 %vm208_vm2, %v370_v43 }
 0x3ea   :  { %v662_v44 = vpop.f32.mrf.mxu1 }
 0x3eb   :  { %v449_v45 = vadd.f32 1e-05, %v662_v44 }
 0x3ec   :  { %v443_v46 = vpop.f32.mrf.mxu1 }
 0x3ed   :  { %673 = vrsqrt.f32 %v449_v45  ;;  %v444_v47 = vadd.f32 1e-05, %v443_v46 }
 0x3ef   :  { %675 = vrsqrt.f32 %v444_v47 }
 0x3fa   :  { %v674_v48 = vpop.eup %673 }
 0x3fb   :  { %v455_v50 = vmul.f32 %v674_v48, %v291_v35 }
 0x3fc   :  { %v676_v51 = vpop.eup %675 }
 0x3fd   :  { %v454_v53 = vmul.f32 %v676_v51, %v290_v37  ;;  %v464_v54 = vmul.f32 %v504_v49, %v455_v50 }
 0x3ff   :  { %v463_v55 = vmul.f32 %v504_v49, %v454_v53  ;;  %v473_v56 = vadd.f32 %v505_v52, %v464_v54 }
 0x401   :  { %v472_v57 = vadd.f32 %v505_v52, %v463_v55  ;;  %v475_v58 = vmax.f32 %v473_v56, 0.0 }
 0x403   :  { %v474_v59 = vmax.f32 %v472_v57, 0.0  ;;  %477 = vst [vmem:[#allocation4 + $0x8] sm:$0xff] %v475_v58 }
 0x405   :  { %476 = vst [vmem:[#allocation4] sm:$0xff] %v474_v59 }
 0x406   :  { %688 = shalt.err (!%p685_p4)
}
 0x407   :  { %s702_s5 = smov 128   ;;  %s703_s6 = smov 8  }
 0x408   :  { %489 = dma.vmem_to_hbm [thread:$0]  %s484_s24, 256, %s839_s7, [#allocation5], %s702_s5, %s702_s5, %s703_s6  }
 0x409   :  { %697 = dma.done.wait [#allocation5], 256  }
 0x40a   :  { %698 = vsyncadd [#allocation5], 4294967040 }
 0x40b   :  { %493 = vsyncpa [#allocation5], 1 }

</bundles_post_ra>
